<compile_context>
chip_gen: v7x
topology: tpu7x:2x2x1
jax: 0.10.0
libtpu: 0.0.40
codegen_flags: <defaults>
</compile_context>

<pallas_src>
import functools

import jax
import jax.numpy as jnp
from jax.experimental import pallas as pl
from jax.experimental.pallas import tpu as pltpu


def _round_up(x, m):
    return ((x + m - 1) // m) * m


def _vmem_capacity_bytes():
    try:
        return int(pltpu.get_tpu_info().vmem_capacity_bytes)
    except Exception:
        return 64 * 1024 * 1024  # conservative: v7x per-TensorCore VMEM


def _num_tensorcores():
    """Best-effort TensorCore count per chip (2 on v7x / v4 / v5p, else 1)."""
    try:
        info = pltpu.get_tpu_info()
        for attr in ("num_cores", "num_tensorcores", "tensorcore_count", "core_count"):
            v = getattr(info, attr, None)
            if isinstance(v, int) and v > 0:
                return v
    except Exception:
        pass
    try:
        kind = jax.devices()[0].device_kind.lower()
        if ("v4" in kind) or ("v5p" in kind) or ("v7" in kind) or ("tpu7" in kind):
            return 2
    except Exception:
        pass
    return 1


# ----------------------------------------------------------------------------
# Kernels
# ----------------------------------------------------------------------------
def _se_fused_kernel(x_ref, w1_ref, w2_ref, o_ref, *, inv_hw):
    # x_ref: (TB, C, HW)  w1_ref: (C, Cr)  w2_ref: (Cr, C)  o_ref: (TB, C, HW)

    # --- squeeze: global average pool (lane reduce, f32 accumulation) ---
    pool = jnp.sum(x_ref[...].astype(jnp.float32), axis=2) * inv_hw        # (TB, C)

    # --- excitation: Linear -> ReLU -> Linear -> Sigmoid (tiny MXU work) ---
    w1 = w1_ref[...].astype(jnp.float32)
    w2 = w2_ref[...].astype(jnp.float32)
    h = jnp.maximum(jnp.dot(pool, w1, preferred_element_type=jnp.float32), 0.0)
    y = jax.nn.sigmoid(jnp.dot(h, w2, preferred_element_type=jnp.float32))  # (TB, C)

    # --- scale: re-read x from VMEM instead of keeping the tile live ---
    o_ref[...] = x_ref[...] * y.astype(o_ref.dtype)[:, :, None]


def _se_pool_gate_kernel(x_ref, w1_ref, w2_ref, gate_ref, acc_ref, *,
                         inv_hw, hw, thw, need_mask):
    # Grid: (n_hw_chunks,) "arbitrary".  x_ref: (B, C, THW); gate_ref: (B, C);
    # acc_ref: (B, C) f32 scratch accumulating the pooled sum over chunks.
    k = pl.program_id(0)

    @pl.when(k == 0)
    def _():
        acc_ref[...] = jnp.zeros_like(acc_ref)

    chunk = x_ref[...].astype(jnp.float32)                                  # (B, C, THW)
    if need_mask:  # zero out lanes past the true HW in the (possibly OOB) tail chunk
        lane = jax.lax.broadcasted_iota(jnp.int32, chunk.shape, 2)
        chunk = jnp.where(k * thw + lane < hw, chunk, 0.0)
    acc_ref[...] += jnp.sum(chunk, axis=2)

    @pl.when(k == pl.num_programs(0) - 1)
    def _():
        pool = acc_ref[...] * inv_hw
        w1 = w1_ref[...].astype(jnp.float32)
        w2 = w2_ref[...].astype(jnp.float32)
        h = jnp.maximum(jnp.dot(pool, w1, preferred_element_type=jnp.float32), 0.0)
        gate_ref[...] = jax.nn.sigmoid(
            jnp.dot(h, w2, preferred_element_type=jnp.float32))


def _se_scale_kernel(gate_ref, x_ref, o_ref):
    # gate_ref: (B, C) f32; x_ref / o_ref: (B, C, THW)
    o_ref[...] = x_ref[...] * gate_ref[...].astype(o_ref.dtype)[:, :, None]


# ----------------------------------------------------------------------------
# Tiling heuristics
# ----------------------------------------------------------------------------
def _choose_batch_tile(B, per_image_bytes, fixed_bytes, budget_bytes, num_cores):
    """Batch tile TB for the fused path; None if even one image does not fit."""
    avail = budget_bytes - fixed_bytes
    if avail < per_image_bytes:
        return None
    max_tb = min(B, int(avail // per_image_bytes))
    if num_cores >= 2:
        # v7x megacore: >=2 steps per core for DMA/compute overlap, and a step
        # count divisible by the core count so both TCs get equal work.
        tb = min(max_tb, max(1, B // (2 * num_cores)))
        if tb > 1:
            for t in range(tb, 0, -1):
                if pl.cdiv(B, t) % num_cores == 0:
                    tb = t
                    break
        return tb
    # Single TC (v5e / v6e): extra steps only add ~0.35us each; take the largest
    # block that fits the budget while keeping ~2 steps for pipeline overlap.
    return min(max_tb, max(1, pl.cdiv(B, 2)))


def _choose_hw_chunk(avail_bytes, per_lane_col_bytes, HW):
    """Largest 128-multiple HW chunk that fits; full HW if everything fits."""
    HWp = _round_up(HW, 128)
    if avail_bytes < per_lane_col_bytes * 128:
        return None
    max_lanes = int(avail_bytes // per_lane_col_bytes)
    thw = (max_lanes // 128) * 128
    if thw >= HWp:
        return HW
    return thw


# ----------------------------------------------------------------------------
# Pallas call wrappers
# ----------------------------------------------------------------------------
def _se_fused(x3, w1, w2, *, HW, TB, vmem_limit):
    B, C, _ = x3.shape
    Cr = w1.shape[1]
    kernel = functools.partial(_se_fused_kernel, inv_hw=float(1.0 / HW))
    return pl.pallas_call(
        kernel,
        out_shape=jax.ShapeDtypeStruct((B, C, HW), x3.dtype),
        grid_spec=pltpu.PrefetchScalarGridSpec(
            num_scalar_prefetch=0,
            grid=(pl.cdiv(B, TB),),
            in_specs=[
                pl.BlockSpec((TB, C, HW), lambda b: (b, 0, 0)),
                pl.BlockSpec((C, Cr), lambda b: (0, 0)),   # weights stay VMEM-resident
                pl.BlockSpec((Cr, C), lambda b: (0, 0)),
            ],
            out_specs=pl.BlockSpec((TB, C, HW), lambda b: (b, 0, 0)),
        ),
        compiler_params=pltpu.CompilerParams(
            dimension_semantics=("parallel",),
            vmem_limit_bytes=vmem_limit,
        ),
    )(x3, w1, w2)


def _se_two_pass(x3, w1, w2, *, HW, THW, vmem_limit):
    B, C, _ = x3.shape
    Cr = w1.shape[1]
    n_chunks = pl.cdiv(HW, THW)
    need_mask = (n_chunks * THW) != HW

    gate_kernel = functools.partial(
        _se_pool_gate_kernel, inv_hw=float(1.0 / HW), hw=HW, thw=THW,
        need_mask=need_mask)
    gate = pl.pallas_call(
        gate_kernel,
        out_shape=jax.ShapeDtypeStruct((B, C), jnp.float32),
        grid_spec=pltpu.PrefetchScalarGridSpec(
            num_scalar_prefetch=0,
            grid=(n_chunks,),
            in_specs=[
                pl.BlockSpec((B, C, THW), lambda k: (0, 0, k)),
                pl.BlockSpec((C, Cr), lambda k: (0, 0)),
                pl.BlockSpec((Cr, C), lambda k: (0, 0)),
            ],
            out_specs=pl.BlockSpec((B, C), lambda k: (0, 0)),   # resident accumulator
            scratch_shapes=[pltpu.VMEM((B, C), jnp.float32)],
        ),
        compiler_params=pltpu.CompilerParams(
            dimension_semantics=("arbitrary",),
            vmem_limit_bytes=vmem_limit,
        ),
    )(x3, w1, w2)

    out3 = pl.pallas_call(
        _se_scale_kernel,
        out_shape=jax.ShapeDtypeStruct((B, C, HW), x3.dtype),
        grid_spec=pltpu.PrefetchScalarGridSpec(
            num_scalar_prefetch=0,
            grid=(n_chunks,),
            in_specs=[
                pl.BlockSpec((B, C), lambda k: (0, 0)),
                pl.BlockSpec((B, C, THW), lambda k: (0, 0, k)),
            ],
            out_specs=pl.BlockSpec((B, C, THW), lambda k: (0, 0, k)),
        ),
        compiler_params=pltpu.CompilerParams(
            dimension_semantics=("parallel",),
            vmem_limit_bytes=vmem_limit,
        ),
    )(gate, x3)
    return out3


@functools.partial(jax.jit, static_argnames=("force_two_pass", "hw_chunk"))
def se_layer(x, w1, w2, *, force_two_pass=False, hw_chunk=None):
    """x: (B, C, H, W); w1: (C, C//r); w2: (C//r, C).

    w1/w2 are the transposes of the PyTorch Linear weights, so
    y = sigmoid(relu(pool @ w1) @ w2).
    """
    B, C, H, W = x.shape
    HW = H * W
    Cr = w1.shape[1]
    x3 = x.reshape(B, C, HW)          # contiguous view: no HBM copy, no padding

    itemsize = jnp.dtype(x.dtype).itemsize
    w_itemsize = jnp.dtype(w1.dtype).itemsize
    Cp8 = _round_up(C, 8)
    HWp = _round_up(HW, 128)          # VMEM lane footprint (HBM stays unpadded)

    # Weights are double-buffered by default -> count 2x their VMEM tiles.
    weights_vmem = 2 * (_round_up(C, 8) * _round_up(Cr, 128)
                        + _round_up(Cr, 8) * _round_up(C, 128)) * w_itemsize
    margin = 2 << 20                  # Mosaic internal scratch headroom
    vmem_cap = _vmem_capacity_bytes()
    budget = int(vmem_cap * 0.7)
    num_cores = _num_tensorcores()

    # Per-image VMEM: 2x in + 2x out (double buffered) + one f32 temp for the
    # pool cast when x is narrower than f32.
    io_bytes = Cp8 * HWp * itemsize
    temp_bytes = Cp8 * HWp * 4 if itemsize < 4 else 0
    per_image = 4 * io_bytes + temp_bytes

    TB = None
    if not force_two_pass:
        TB = _choose_batch_tile(B, per_image, weights_vmem + margin, budget, num_cores)

    if TB is not None:
        needed = TB * per_image + weights_vmem + margin
        vmem_limit = int(max(32 << 20, min(needed + (4 << 20), int(vmem_cap * 0.9))))
        out3 = _se_fused(x3, w1, w2, HW=HW, TB=TB, vmem_limit=vmem_limit)
    else:
        # Two-pass fallback: one image's block exceeds the VMEM budget.
        small_vmem = 3 * _round_up(B, 8) * _round_up(C, 128) * 4   # gate out + acc
        fixed2 = weights_vmem + small_vmem + margin
        per_lane_col = B * Cp8 * (4 * itemsize + 4)                # 4x io + f32 temp
        if hw_chunk is not None:
            THW = HW if hw_chunk >= HW else max(128, (int(hw_chunk) // 128) * 128)
        else:
            THW = _choose_hw_chunk(budget - fixed2, per_lane_col, HW)
        if THW is None:
            # TODO(synk): also tile B (and C) when even a 128-lane chunk of all
            # images exceeds VMEM; fall back to plain XLA (still ~HBM roofline).
            pool = jnp.mean(x3.astype(jnp.float32), axis=2)
            h = jnp.maximum(pool @ w1.astype(jnp.float32), 0.0)
            y = jax.nn.sigmoid(h @ w2.astype(jnp.float32))
            out3 = x3 * y.astype(x3.dtype)[:, :, None]
        else:
            needed = per_lane_col * THW + fixed2
            vmem_limit = int(max(32 << 20, min(needed + (4 << 20), int(vmem_cap * 0.9))))
            out3 = _se_two_pass(x3, w1, w2, HW=HW, THW=THW, vmem_limit=vmem_limit)

    return out3.reshape(B, C, H, W)


def se_layer_ref(x, w1, w2):
    """Pure-JAX reference matching the PyTorch module semantics."""
    pool = jnp.mean(x, axis=(2, 3))                      # (B, C)
    h = jnp.maximum(pool @ w1, 0.0)                      # (B, C//r)
    y = jax.nn.sigmoid(h @ w2)                           # (B, C)
    return x * y[:, :, None, None]


# ----------------------------------------------------------------------------
# Self-test
# ----------------------------------------------------------------------------
if __name__ == "__main__":
    root = jax.random.PRNGKey(0)

    def make_inputs(key, B, C, H, W, reduction, dtype):
        kx, k1, k2 = jax.random.split(key, 3)
        Cr = max(1, C // reduction)
        x = jax.random.normal(kx, (B, C, H, W), dtype=jnp.float32).astype(dtype)
        w1 = jax.random.normal(k1, (C, Cr), dtype=jnp.float32) * 0.1
        w2 = jax.random.normal(k2, (Cr, C), dtype=jnp.float32) * 0.1
        return x, w1, w2

    keys = jax.random.split(root, 5)

    # Case 1: HW multiple of 128 (original test shape), f32.
    x, w1, w2 = make_inputs(keys[0], 2, 32, 16, 16, 16, jnp.float32)
    out = jax.block_until_ready(se_layer(x, w1, w2))
    ref = se_layer_ref(x, w1, w2)
    assert out.shape == x.shape
    assert jnp.allclose(out, ref, atol=1e-5, rtol=1e-5)

    # Case 2: non-128-multiple spatial size (full-extent minor dim, no pad).
    x, w1, w2 = make_inputs(keys[1], 4, 32, 7, 7, 4, jnp.float32)
    out = jax.block_until_ready(se_layer(x, w1, w2))
    ref = se_layer_ref(x, w1, w2)
    assert jnp.allclose(out, ref, atol=1e-5, rtol=1e-5)

    # Case 3: batch not divisible by the batch tile (uneven cdiv grid).
    x, w1, w2 = make_inputs(keys[2], 3, 32, 9, 9, 4, jnp.float32)
    out = jax.block_until_ready(se_layer(x, w1, w2))
    ref = se_layer_ref(x, w1, w2)
    assert jnp.allclose(out, ref, atol=1e-5, rtol=1e-5)

    # Case 4: bf16 streaming (f32 pool/gate math inside the kernel).
    x, w1, w2 = make_inputs(keys[3], 2, 32, 16, 16, 16, jnp.bfloat16)
    out = jax.block_until_ready(se_layer(x, w1, w2))
    ref = se_layer_ref(x.astype(jnp.float32), w1, w2)
    assert jnp.allclose(out.astype(jnp.float32), ref, atol=6e-2, rtol=5e-2)

    # Case 5: force the two-pass (HW-chunked) fallback with a 128-lane chunk,
    # exercising chunk accumulation and the masked partial tail (HW=400).
    x, w1, w2 = make_inputs(keys[4], 2, 32, 20, 20, 4, jnp.float32)
    out = jax.block_until_ready(se_layer(x, w1, w2, force_two_pass=True, hw_chunk=128))
    ref = se_layer_ref(x, w1, w2)
    assert jnp.allclose(out, ref, atol=1e-5, rtol=1e-5)

    print("KERNEL_OK")
</pallas_src>

<mosaic_0001>
module attributes {stable_mosaic.version = 11 : i64} {
  func.func @_se_fused_kernel(%arg0: i32, %arg1: memref<1x32x256xf32, #tpu.memory_space<vmem>>, %arg2: memref<32x2xf32, #tpu.memory_space<vmem>>, %arg3: memref<2x32xf32, #tpu.memory_space<vmem>>, %arg4: memref<1x32x256xf32, #tpu.memory_space<vmem>>) attributes {dimension_semantics = [#tpu.dimension_semantics<parallel>], iteration_bounds = array<i64: 2>, scalar_prefetch = 0 : i64, scratch_operands = 0 : i64, tpu.core_type = #tpu.core_type<tc>, window_params = [{transform_indices = @transform_0, window_bounds = array<i64: 1, 32, 256>}, {pipeline_mode = #tpu.pipeline_mode<synchronous>, transform_indices = @transform_1, window_bounds = array<i64: 32, 2>}, {pipeline_mode = #tpu.pipeline_mode<synchronous>, transform_indices = @transform_2, window_bounds = array<i64: 2, 32>}, {transform_indices = @transform_3, window_bounds = array<i64: 1, 32, 256>}]} {
    %c0 = arith.constant 0 : index
    %c0_0 = arith.constant 0 : index
    %c0_1 = arith.constant 0 : index
    %0 = vector.load %arg1[%c0, %c0_0, %c0_1] : memref<1x32x256xf32, #tpu.memory_space<vmem>>, vector<1x32x256xf32>
    %cst = arith.constant dense<0.000000e+00> : vector<1x32xf32>
    %1 = vector.multi_reduction <add>, %0, %cst [2] : vector<1x32x256xf32> to vector<1x32xf32>
    %cst_2 = arith.constant 3.906250e-03 : f32
    %2 = vector.broadcast %cst_2 : f32 to vector<1x32xf32>
    %3 = arith.mulf %1, %2 : vector<1x32xf32>
    %c0_3 = arith.constant 0 : index
    %c0_4 = arith.constant 0 : index
    %4 = vector.load %arg2[%c0_3, %c0_4] : memref<32x2xf32, #tpu.memory_space<vmem>>, vector<32x2xf32>
    %c0_5 = arith.constant 0 : index
    %c0_6 = arith.constant 0 : index
    %5 = vector.load %arg3[%c0_5, %c0_6] : memref<2x32xf32, #tpu.memory_space<vmem>>, vector<2x32xf32>
    %cst_7 = arith.constant dense<0.000000e+00> : vector<1x2xf32>
    %6 = tpu.matmul %3, %4, %cst_7 {dimension_numbers = #tpu.dot_dimension_numbers<[1], [0], [0], [1], [0, 0, 1, 1], [], []>} : vector<1x32xf32>, vector<32x2xf32>, vector<1x2xf32> -> vector<1x2xf32>
    %cst_8 = arith.constant 0.000000e+00 : f32
    %7 = vector.broadcast %cst_8 : f32 to vector<1x2xf32>
    %8 = arith.maximumf %6, %7 : vector<1x2xf32>
    %cst_9 = arith.constant dense<0.000000e+00> : vector<1x32xf32>
    %9 = tpu.matmul %8, %5, %cst_9 {dimension_numbers = #tpu.dot_dimension_numbers<[1], [0], [0], [1], [0, 0, 1, 1], [], []>} : vector<1x2xf32>, vector<2x32xf32>, vector<1x32xf32> -> vector<1x32xf32>
    %10 = arith.negf %9 : vector<1x32xf32>
    %11 = math.exp %10 : vector<1x32xf32>
    %cst_10 = arith.constant 1.000000e+00 : f32
    %12 = vector.broadcast %cst_10 : f32 to vector<1x32xf32>
    %13 = arith.addf %12, %11 : vector<1x32xf32>
    %14 = arith.divf %12, %13 : vector<1x32xf32>
    %c0_11 = arith.constant 0 : index
    %c0_12 = arith.constant 0 : index
    %c0_13 = arith.constant 0 : index
    %15 = vector.load %arg1[%c0_11, %c0_12, %c0_13] : memref<1x32x256xf32, #tpu.memory_space<vmem>>, vector<1x32x256xf32>
    %16 = vector.shape_cast %14 : vector<1x32xf32> to vector<1x32x1xf32>
    %17 = vector.broadcast %16 : vector<1x32x1xf32> to vector<1x32x256xf32>
    %18 = arith.mulf %15, %17 : vector<1x32x256xf32>
    %c0_14 = arith.constant 0 : index
    %c0_15 = arith.constant 0 : index
    %c0_16 = arith.constant 0 : index
    %19 = vector.load %arg4[%c0_14, %c0_15, %c0_16] : memref<1x32x256xf32, #tpu.memory_space<vmem>>, vector<1x32x256xf32>
    tpu.vector_store %arg4[%c0_14, %c0_15, %c0_16], %18 {strides = array<i32>} : memref<1x32x256xf32, #tpu.memory_space<vmem>>, vector<1x32x256xf32>,
    return
  }
  func.func @transform_0(%arg0: i32) -> (i32, i32, i32) {
    %c0_i32 = arith.constant 0 : i32
    %c0_i32_0 = arith.constant 0 : i32
    %c0_i32_1 = arith.constant 0 : i32
    return %arg0, %c0_i32, %c0_i32_0 : i32, i32, i32
  }
  func.func @transform_1(%arg0: i32) -> (i32, i32) {
    %c0_i32 = arith.constant 0 : i32
    %c0_i32_0 = arith.constant 0 : i32
    %c0_i32_1 = arith.constant 0 : i32
    return %c0_i32, %c0_i32_0 : i32, i32
  }
  func.func @transform_2(%arg0: i32) -> (i32, i32) {
    %c0_i32 = arith.constant 0 : i32
    %c0_i32_0 = arith.constant 0 : i32
    %c0_i32_1 = arith.constant 0 : i32
    return %c0_i32, %c0_i32_0 : i32, i32
  }
  func.func @transform_3(%arg0: i32) -> (i32, i32, i32) {
    %c0_i32 = arith.constant 0 : i32
    %c0_i32_0 = arith.constant 0 : i32
    %c0_i32_1 = arith.constant 0 : i32
    return %arg0, %c0_i32, %c0_i32_0 : i32, i32, i32
  }
}

</mosaic_0001>

<bundles_post_ra>
// kernel: se_layer.1
= control target key start
LH: loop header
LB: loop body
LE: loop exit
PB: predicated region body
PF: predicated region fallthrough
CT: control target
= control target key end

     0   :  { %s571_s12 = smov 0   ;;  %s642_s0 = inlined_call_operand.vmem [shape: f32[2,32,256], index: 0, kind: input, shape index: {}]   ;;  %s643_s1 = inlined_call_operand.vmem [shape: f32[32,2], index: 1, kind: input, shape index: {}]   ;;  %s644_s2 = inlined_call_operand.vmem [shape: f32[2,32], index: 2, kind: input, shape index: {}]   ;;  %s645_s3 = inlined_call_operand.vmem [shape: f32[2,32,256], index: 3, kind: output, shape index: {}]  }
   0x1 LB: > { %s479_s13 = sadd.s32 4294967295, %s546_s12   ;;  %p483_p0 = scmp.ge.s32.totalorder %s546_s12, 1  ;;  %s546_s12 = sphi %s571_s12, %s13_s12  }
   0x2   : > { %p137_p1 = scmp.lt.s32.totalorder %s546_s12, 3 }
   0x4   : > { %p138_p2 = pnand %p483_p0, %p137_p1 }
   0x5   : > { %p161_p3 = scmp.lt.s32.totalorder (!%p138_p2), %s479_s13, 1  ;;  %v195_v12 = vld [vmem:[%s643_s1] sm:$0xff] (!%p138_p2)  ;;  %v196_v13 = vld [vmem:[%s643_s1 + $0x8] sm:$0xff] (!%p138_p2)  ;;  %v548_v15 = vmov (!%p138_p2), 0.0|0.0   ;;  %v197_v16 = vld [vmem:[%s643_s1 + $0x10] sm:$0xff] (!%p138_p2)  ;;  %vm549_vm0 = vmmov (!%p138_p2), 0   ;;  %v204_v20 = vlaneseq (!%p138_p2) }
   0x6   : > { %141 = sbr.rel (%p138_p2) target bundleno = 752 (0x2f0), region = 32  ;;  %v520_v14 = vpack.c.bf16 (!%p138_p2), %v196_v13, %v195_v12  ;;  %519 = vmatprep.subr.bf16.mxu0 (!%p138_p2), %v548_v15  ;;  %v198_v17 = vld [vmem:[%s643_s1 + $0x18] sm:$0xff] (!%p138_p2)  ;;  %v550_v19 = vmov (!%p138_p2), 0.0   ;;  %vm215_vm1 = vcmask (!%p138_p2), 130112   ;;  %vm222_vm2 = vcmask (!%p138_p2), 195712  }
   0x7   : > { %v523_v18 = vpack.c.bf16 (!%p138_p2), %v198_v17, %v197_v16  ;;  %511 = vmatprep.mubr.msk.f32.mxu0 (!%p138_p2), %vm549_vm0, %v550_v19  ;;  %514 = vmatprep.subr.mxu1 (!%p138_p2), %v550_v19  ;;  %v205_v21 = vand.u32 (!%p138_p2), 127, %v204_v20  ;;  %v207_v22 = vshrl.u32 (!%p138_p2), %v204_v20, 7  ;;  %vm229_vm3 = vcmask (!%p138_p2), 261312   ;;  %v199_v45 = vld [vmem:[%s644_s2] sm:$0x3] (!%p138_p2) }
   0x8   : > { %521 = vmatpush3.bf16.msra.mxu0 (!%p138_p2), %v520_v14  ;;  %516 = vmatprep.mubr.msk.f32.mxu1 (!%p138_p2), %vm549_vm0, %v550_v19  ;;  %vm231_vm4 = vcmask (!%p138_p2), 261120   ;;  %vm309_vm5 = vcmask (!%p138_p2), 1041408   ;;  %vm305_vm6 = vcmask (!%p138_p2), 15360  }
   0x9   : > { %522 = vmatprep.subr.bf16.mxu0 (!%p138_p2), %v548_v15  ;;  %v210_v23 = vadd.s32 (!%p138_p2), 4294967288, %v205_v21  ;;  %v217_v25 = vadd.s32 (!%p138_p2), 4294967280, %v205_v21  ;;  %v224_v26 = vadd.s32 (!%p138_p2), 4294967272, %v205_v21  ;;  %v208_v28 = vsub.s32 (!%p138_p2), %v205_v21, %v207_v22  ;;  %515 = vmatpush3.msk.msra.mxu1 (!%p138_p2), %vm309_vm5, %v199_v45 }
   0xa   : > { %v391_v54 = vsub.s32 (!%p138_p2), 0, %v207_v22 }
   0xb   : > { %v213_v30 = vsub.s32 (!%p138_p2), %v210_v23, %v207_v22  ;;  %v220_v31 = vsub.s32 (!%p138_p2), %v217_v25, %v207_v22  ;;  %v227_v34 = vsub.s32 (!%p138_p2), %v224_v26, %v207_v22 }
   0xc   : > { %524 = vmatpush3.bf16.msra.mxu0 (!%p138_p2), %v523_v18 }
   0xd   : > { %s647_s13 = smov (!%p161_p3, %s479_s13), 1 }
   0xe   : > { %s494_s14 = sshll.u32 %s647_s13, 6 }
   0xf   : > { %s165_s17 = scalar_lea.vmem %s642_s0, %s494_s14  ;;  %s170_s30 = scalar_lea.vmem %s645_s3, %s494_s14 }
  0x10   : > { %v587_v0 = vld [vmem:[%s165_s17] sm:$0xff]  ;;  %v589_v1 = vld [vmem:[%s165_s17 + $0x8] sm:$0xff]  ;;  %v597_v5 = vld [vmem:[%s165_s17 + $0x10] sm:$0xff] }
  0x11   : > { %v591_v2 = vld [vmem:[%s165_s17 + $0x20] sm:$0xff]  ;;  %v179_v3 = vadd.f32 %v589_v1, %v587_v0  ;;  %v595_v4 = vld [vmem:[%s165_s17 + $0x28] sm:$0xff]  ;;  %v599_v6 = vld [vmem:[%s165_s17 + $0x18] sm:$0xff] }
  0x12   : > { %v185_v7 = vadd.f32 %v595_v4, %v591_v2  ;;  %v603_v8 = vld [vmem:[%s165_s17 + $0x30] sm:$0xff]  ;;  %v605_v9 = vld [vmem:[%s165_s17 + $0x38] sm:$0xff]  ;;  %v182_v10 = vadd.f32 %v599_v6, %v597_v5 }
  0x13   : > { %180 = vadd.xlane.f32.xlu0 %v179_v3  ;;  %v188_v11 = vadd.f32 %v605_v9, %v603_v8 }
  0x14   : > { %186 = vadd.xlane.f32.xlu1 %v185_v7 }
  0x17   : > { %183 = vadd.xlane.f32.xlu0 %v182_v10 }
  0x18   : > { %189 = vadd.xlane.f32.xlu1 %v188_v11 }
  0xa0   : > { %v181_v24 = vpop.xlane.xlu0 %180 }
  0xa1   : > { %v187_v27 = vpop.xlane.xlu1 %186  ;;  %v191_v29 = vmul.f32 0.00390625, %v181_v24 }
  0xa2   : > { %v193_v32 = vmul.f32 0.00390625, %v187_v27 }
  0xa3   : > { %v209_v38 = vrot.slane %v191_v29, %v208_v28 }
  0xa4   : > { %v184_v33 = vpop.xlane.xlu0 %183  ;;  %v221_v40 = vrot.slane %v193_v32, %v220_v31 }
  0xa5   : > { %v192_v35 = vmul.f32 0.00390625, %v184_v33  ;;  %v190_v36 = vpop.xlane.xlu1 %189 }
  0xa6   : > { %v194_v37 = vmul.f32 0.00390625, %v190_v36 }
  0xa7   : > { %v214_v39 = vrot.slane %v192_v35, %v213_v30 }
  0xa8   : > { %v228_v41 = vrot.slane %v194_v37, %v227_v34 }
  0xa9   : > { %v216_v42 = vsel %vm215_vm1, %v214_v39, %v209_v38 }
  0xaa   : > { %v223_v43 = vsel %vm222_vm2, %v221_v40, %v216_v42 }
  0xab   : > { %v230_v44 = vsel %vm229_vm3, %v228_v41, %v223_v43 }
  0xac   : > { %512 = vmatmul.mubr.msk.f32.vlgmr.msra.gmra.mrb[0].mxu0 %vm231_vm4, %v230_v44 }
 0x17f   : > { %v300_v46 = vpop.f32.mrb[0].mxu0 }
 0x180   : > { %v304_v47 = vmax.f32 %v300_v46, 0.0  ;;  %v513_v48 = vpop.f32.mrb[1].mxu0 }
 0x182   : > { %517 = vmatmul.mubr.msk.f32.vlgmr.msra.gmra.mrb[0].mxu1 %vm305_vm6, %v304_v47 }
 0x255   : > { %v379_v49 = vpop.f32.mrb[0].mxu1 }
 0x256   : > { %v491_v50 = vmul.f32 -1.442695, %v379_v49  ;;  %v518_v51 = vpop.f32.mrb[1].mxu1 }
 0x258   : > { %536 = vpow2.f32 %v491_v50 }
 0x262   : > { %v537_v52 = vpop.eup %536 }
 0x263   : > { %v386_v53 = vadd.f32 1.0, %v537_v52 }
 0x265   : > { %538 = vrcp.f32 %v386_v53 }
 0x26f   : > { %v539_v55 = vpop.eup %538 }
 0x270   : > { %v392_v56 = vrot.slane %v539_v55, %v391_v54 }
 0x272   : > { %398 = vbcast.lane.b32.xlu1 %v392_v56, 264  ;;  %394 = vbcast.lane.b32.xlu0 %v392_v56, 256 }
 0x276   : > { %402 = vbcast.lane.b32.xlu1 %v392_v56, 272 }
 0x27a   : > { %406 = vbcast.lane.b32.xlu1 %v392_v56, 280 }
 0x2e4   : > { %v399_v57 = vpop.permute.xlu1 %398  ;;  %v395_v58 = vpop.permute.xlu0 %394 }
 0x2e5   : > { %v410_v59 = vmul.f32 %v399_v57, %v597_v5  ;;  %v411_v60 = vmul.f32 %v399_v57, %v599_v6  ;;  %v408_v61 = vmul.f32 %v395_v58, %v587_v0  ;;  %v409_v62 = vmul.f32 %v395_v58, %v589_v1 }
 0x2e7   : > { %418 = vst [vmem:[%s170_s30 + $0x10] sm:$0xff] %v410_v59  ;;  %419 = vst [vmem:[%s170_s30 + $0x18] sm:$0xff] %v411_v60 }
 0x2e8   : > { %416 = vst [vmem:[%s170_s30] sm:$0xff] %v408_v61  ;;  %417 = vst [vmem:[%s170_s30 + $0x8] sm:$0xff] %v409_v62  ;;  %v403_v63 = vpop.permute.xlu1 %402 }
 0x2e9   : > { %v412_v3 = vmul.f32 %v403_v63, %v591_v2  ;;  %v413_v7 = vmul.f32 %v403_v63, %v595_v4 }
 0x2eb   : > { %420 = vst [vmem:[%s170_s30 + $0x20] sm:$0xff] %v412_v3  ;;  %421 = vst [vmem:[%s170_s30 + $0x28] sm:$0xff] %v413_v7 }
 0x2ec   : > { %v407_v10 = vpop.permute.xlu1 %406 }
 0x2ed   : > { %v414_v5 = vmul.f32 %v407_v10, %v603_v8  ;;  %v415_v6 = vmul.f32 %v407_v10, %v605_v9 }
 0x2ef   : > { %422 = vst [vmem:[%s170_s30 + $0x30] sm:$0xff] %v414_v5  ;;  %423 = vst [vmem:[%s170_s30 + $0x38] sm:$0xff] %v415_v6 }
 0x2f0 PF: > { %s13_s12 = sadd.s32 1, %s546_s12  }
 0x2f1   : > { %p10_p4 = scmp.ge.s32.totalorder %s13_s12, 4  }
 0x2f3   :  { %12 = sbr.rel (!%p10_p4) target bundleno = 1 (0x1), region = 62 }

</bundles_post_ra>
